<compile_context>
chip_gen: v5e
topology: v5e:2x2
jax: 0.10.0
libtpu: 0.0.40
codegen_flags: <defaults>
</compile_context>

<pallas_src>
import jax
import jax.numpy as jnp
from jax.experimental import pallas as pl
from jax.experimental.pallas import tpu as pltpu


def attention_kernel(x_ref, w1_ref, b1_ref, w2_ref, b2_ref, o_ref):
    # x:  (TILE_N, F) streamed tile          w1: (F, H), b1: (1, H)  (resident)
    # w2: (1, H) resident row                b2: (1, 1) resident scalar
    # o:  (TILE_N, 1) per-row scores for this tile
    # fc1 on the MXU (bf16 or f32 inputs, f32 accumulation).
    h = jnp.dot(x_ref[...], w1_ref[...], preferred_element_type=jnp.float32)
    # Bias + ReLU in f32 on the VPU.
    h = jnp.maximum(h + b1_ref[...], 0.0)
    # fc2 (H -> 1) off the MXU: VPU multiply + XLU lane reduce.  keepdims keeps
    # the result sublane-major so no sublane->lane relayout is needed.
    y = jnp.sum(h * w2_ref[...], axis=-1, keepdims=True) + b2_ref[0, 0]
    # Sigmoid on the EUP.
    o_ref[...] = jax.nn.sigmoid(y)


def _round_up(x, m):
    return ((x + m - 1) // m) * m


def _choose_tile(n, tile_n):
    """128-aligned row tile, capped at tile_n, split in two when N fits one tile."""
    t = _round_up(max(1, min(tile_n, n)), 128)
    # Prefer >=2 grid steps when there's enough work so both v7x TensorCores get
    # a share of the ("parallel",) row grid.  No-op on single-TC v5e/v6e.
    if n > 128 and n <= t:
        t = max(128, _round_up(-(-n // 2), 128))
    return t


def reference_forward(x2d, w1, b1, w2, b2):
    """Plain-jnp sigmoid(relu(x @ w1 + b1) @ w2 + b2) on (N, F) rows."""
    return jax.nn.sigmoid(
        jnp.maximum(x2d @ w1 + b1.reshape(1, -1), 0.0) @ w2 + b2.reshape(1, 1))


def attention_module_forward(feature_segments, w1, b1, w2, b2, *,
                             tile_n=2048, use_bf16=True, min_pallas_rows=1024):
    """sigmoid(relu(x @ w1 + b1) @ w2 + b2) over the last dim of (B, T, F).

    Weights are stored (in_features, out_features), i.e. transposed vs PyTorch.
    Returns (B, T, 1) float32.
    """
    B, T, F = feature_segments.shape
    H = w1.shape[1]                               # hidden width (256)
    N = B * T

    # Tiny inputs: a fused XLA epilogue beats launch + grid-step overhead.
    if N < min_pallas_rows:
        return reference_forward(
            feature_segments.reshape(N, F), w1, b1, w2, b2).reshape(B, T, 1)

    TILE_N = _choose_tile(N, tile_n)
    num_tiles = pl.cdiv(N, TILE_N)
    N_pad = num_tiles * TILE_N        # output buffer only; x itself is NOT padded

    x2d = feature_segments.reshape(N, F)
    if use_bf16:
        x_in = x2d.astype(jnp.bfloat16)
        w1_in = w1.astype(jnp.bfloat16)
    else:
        x_in = x2d.astype(jnp.float32)
        w1_in = w1.astype(jnp.float32)

    b1_row = b1.reshape(1, H).astype(jnp.float32)
    w2_row = w2.reshape(1, H).astype(jnp.float32)     # (H, 1) -> (1, H)
    b2_s = b2.reshape(1, 1).astype(jnp.float32)

    itemsize = jnp.dtype(x_in.dtype).itemsize
    cost = pl.CostEstimate(
        flops=2 * N * F * H + 4 * N * H,
        transcendentals=N,
        bytes_accessed=N * F * itemsize + F * H * itemsize
        + (2 * H + 1) * 4 + N_pad * 4,
    )

    out = pl.pallas_call(
        attention_kernel,
        out_shape=jax.ShapeDtypeStruct((N_pad, 1), jnp.float32),
        grid=(num_tiles,),
        in_specs=[
            pl.BlockSpec((TILE_N, F), lambda i: (i, 0)),   # x tile (streamed; ragged tail clamped)
            pl.BlockSpec((F, H), lambda i: (0, 0)),        # w1 (resident)
            pl.BlockSpec((1, H), lambda i: (0, 0)),        # b1 (resident)
            pl.BlockSpec((1, H), lambda i: (0, 0)),        # w2 row (resident)
            pl.BlockSpec((1, 1), lambda i: (0, 0)),        # b2 (resident)
        ],
        out_specs=pl.BlockSpec((TILE_N, 1), lambda i: (i, 0)),
        compiler_params=pltpu.CompilerParams(
            dimension_semantics=("parallel",),
            vmem_limit_bytes=16 * 1024 * 1024,
        ),
        cost_estimate=cost,
    )(x_in, w1_in, b1_row, w2_row, b2_s)

    # Drop the (garbage) rows beyond N, restore (B, T, 1).
    return out[:N].reshape(B, T, 1)


def init_params(key, feature_size, hidden=256):
    """Deterministic init mimicking nn.Linear's uniform(-1/sqrt(fan_in), 1/sqrt(fan_in))."""
    k1, k2, k3, k4 = jax.random.split(key, 4)
    bound1 = 1.0 / jnp.sqrt(jnp.float32(feature_size))
    bound2 = 1.0 / jnp.sqrt(jnp.float32(hidden))
    # Stored as (in_features, out_features) == transpose of PyTorch's weight layout.
    w1 = jax.random.uniform(k1, (feature_size, hidden), jnp.float32, -bound1, bound1)
    b1 = jax.random.uniform(k2, (1, hidden), jnp.float32, -bound1, bound1)
    w2 = jax.random.uniform(k3, (hidden, 1), jnp.float32, -bound2, bound2)
    b2 = jax.random.uniform(k4, (1, 1), jnp.float32, -bound2, bound2)
    return w1, b1, w2, b2


if __name__ == "__main__":
    key = jax.random.PRNGKey(0)
    k_x, k_p, k_x2 = jax.random.split(key, 3)

    batch, seq, feature_size = 2, 8, 32
    x_small = jax.random.normal(k_x, (batch, seq, feature_size), jnp.float32)
    w1, b1, w2, b2 = init_params(k_p, feature_size)
    ref_small = reference_forward(
        x_small.reshape(-1, feature_size), w1, b1, w2, b2).reshape(batch, seq, 1)

    # 1) Pallas path forced (fallback off), default bf16 matmul inputs.
    out_bf16 = attention_module_forward(x_small, w1, b1, w2, b2, min_pallas_rows=0)
    jax.block_until_ready(out_bf16)
    assert out_bf16.shape == (batch, seq, 1)
    assert jnp.allclose(out_bf16, ref_small, atol=2e-2, rtol=2e-2)

    # 2) Pallas path in full f32 for a tight numerical check.
    out_f32 = attention_module_forward(x_small, w1, b1, w2, b2,
                                       use_bf16=False, min_pallas_rows=0)
    jax.block_until_ready(out_f32)
    assert jnp.allclose(out_f32, ref_small, atol=1e-5, rtol=1e-5)

    # 3) Multi-tile grid with a ragged tail and no wrapper-side padding:
    #    N = 400 rows, TILE_N = 128 -> 4 tiles, last tile has only 16 valid rows.
    batch2, seq2 = 2, 200
    x_big = jax.random.normal(k_x2, (batch2, seq2, feature_size), jnp.float32)
    ref_big = reference_forward(
        x_big.reshape(-1, feature_size), w1, b1, w2, b2).reshape(batch2, seq2, 1)
    out_big = attention_module_forward(x_big, w1, b1, w2, b2,
                                       tile_n=128, min_pallas_rows=0)
    jax.block_until_ready(out_big)
    assert out_big.shape == (batch2, seq2, 1)
    assert jnp.allclose(out_big, ref_big, atol=2e-2, rtol=2e-2)

    # 4) Small-N fallback path (pure jnp, no kernel launch).
    out_fb = attention_module_forward(x_small, w1, b1, w2, b2)
    jax.block_until_ready(out_fb)
    assert jnp.allclose(out_fb, ref_small, atol=1e-5, rtol=1e-5)

    print("KERNEL_OK")
</pallas_src>

<mosaic_0001>
module attributes {stable_mosaic.version = 11 : i64} {
  func.func @attention_kernel(%arg0: i32, %arg1: memref<128x32xbf16, #tpu.memory_space<vmem>>, %arg2: memref<32x256xbf16, #tpu.memory_space<vmem>>, %arg3: memref<1x256xf32, #tpu.memory_space<vmem>>, %arg4: memref<1x256xf32, #tpu.memory_space<vmem>>, %arg5: memref<1x1xf32, #tpu.memory_space<vmem>>, %arg6: memref<128x1xf32, #tpu.memory_space<vmem>>) attributes {dimension_semantics = [#tpu.dimension_semantics<parallel>], iteration_bounds = array<i64: 1>, scalar_prefetch = 0 : i64, scratch_operands = 0 : i64, tpu.core_type = #tpu.core_type<tc>, window_params = [{transform_indices = @transform_0, window_bounds = array<i64: 128, 32>}, {pipeline_mode = #tpu.pipeline_mode<synchronous>, transform_indices = @transform_1, window_bounds = array<i64: 32, 256>}, {pipeline_mode = #tpu.pipeline_mode<synchronous>, transform_indices = @transform_2, window_bounds = array<i64: 1, 256>}, {pipeline_mode = #tpu.pipeline_mode<synchronous>, transform_indices = @transform_3, window_bounds = array<i64: 1, 256>}, {pipeline_mode = #tpu.pipeline_mode<synchronous>, transform_indices = @transform_4, window_bounds = array<i64: 1, 1>}, {transform_indices = @transform_5, window_bounds = array<i64: 128, 1>}]} {
    %c0 = arith.constant 0 : index
    %c0_0 = arith.constant 0 : index
    %0 = vector.load %arg1[%c0, %c0_0] : memref<128x32xbf16, #tpu.memory_space<vmem>>, vector<128x32xbf16>
    %c0_1 = arith.constant 0 : index
    %c0_2 = arith.constant 0 : index
    %1 = vector.load %arg2[%c0_1, %c0_2] : memref<32x256xbf16, #tpu.memory_space<vmem>>, vector<32x256xbf16>
    %cst = arith.constant dense<0.000000e+00> : vector<128x256xf32>
    %2 = tpu.matmul %0, %1, %cst {dimension_numbers = #tpu.dot_dimension_numbers<[1], [0], [0], [1], [0, 0, 1, 1], [], []>} : vector<128x32xbf16>, vector<32x256xbf16>, vector<128x256xf32> -> vector<128x256xf32>
    %c0_3 = arith.constant 0 : index
    %c0_4 = arith.constant 0 : index
    %3 = vector.load %arg3[%c0_3, %c0_4] : memref<1x256xf32, #tpu.memory_space<vmem>>, vector<1x256xf32>
    %4 = vector.broadcast %3 : vector<1x256xf32> to vector<128x256xf32>
    %5 = arith.addf %2, %4 : vector<128x256xf32>
    %cst_5 = arith.constant 0.000000e+00 : f32
    %6 = vector.broadcast %cst_5 : f32 to vector<128x256xf32>
    %7 = arith.maximumf %5, %6 : vector<128x256xf32>
    %c0_6 = arith.constant 0 : index
    %c0_7 = arith.constant 0 : index
    %8 = vector.load %arg4[%c0_6, %c0_7] : memref<1x256xf32, #tpu.memory_space<vmem>>, vector<1x256xf32>
    %9 = vector.broadcast %8 : vector<1x256xf32> to vector<128x256xf32>
    %10 = arith.mulf %7, %9 : vector<128x256xf32>
    %cst_8 = arith.constant dense<0.000000e+00> : vector<128xf32>
    %11 = vector.multi_reduction <add>, %10, %cst_8 [1] : vector<128x256xf32> to vector<128xf32>
    %12 = vector.shape_cast %11 : vector<128xf32> to vector<128x1xf32>
    %c0_9 = arith.constant 0 : index
    %c0_10 = arith.constant 0 : index
    %13 = vector.load %arg5[%c0_9, %c0_10] : memref<1x1xf32, #tpu.memory_space<vmem>>, vector<1x1xf32>
    %14 = vector.extract %13[0, 0] : f32 from vector<1x1xf32>
    %15 = vector.broadcast %14 : f32 to vector<128x1xf32>
    %16 = arith.addf %12, %15 : vector<128x1xf32>
    %17 = arith.negf %16 : vector<128x1xf32>
    %18 = math.exp %17 : vector<128x1xf32>
    %cst_11 = arith.constant 1.000000e+00 : f32
    %19 = vector.broadcast %cst_11 : f32 to vector<128x1xf32>
    %20 = arith.addf %19, %18 : vector<128x1xf32>
    %21 = arith.divf %19, %20 : vector<128x1xf32>
    %c0_12 = arith.constant 0 : index
    %c0_13 = arith.constant 0 : index
    %22 = vector.load %arg6[%c0_12, %c0_13] : memref<128x1xf32, #tpu.memory_space<vmem>>, vector<128x1xf32>
    tpu.vector_store %arg6[%c0_12, %c0_13], %21 {strides = array<i32>} : memref<128x1xf32, #tpu.memory_space<vmem>>, vector<128x1xf32>,
    return
  }
  func.func @transform_0(%arg0: i32) -> (i32, i32) {
    %c0_i32 = arith.constant 0 : i32
    %c0_i32_0 = arith.constant 0 : i32
    return %arg0, %c0_i32 : i32, i32
  }
  func.func @transform_1(%arg0: i32) -> (i32, i32) {
    %c0_i32 = arith.constant 0 : i32
    %c0_i32_0 = arith.constant 0 : i32
    %c0_i32_1 = arith.constant 0 : i32
    return %c0_i32, %c0_i32_0 : i32, i32
  }
  func.func @transform_2(%arg0: i32) -> (i32, i32) {
    %c0_i32 = arith.constant 0 : i32
    %c0_i32_0 = arith.constant 0 : i32
    %c0_i32_1 = arith.constant 0 : i32
    return %c0_i32, %c0_i32_0 : i32, i32
  }
  func.func @transform_3(%arg0: i32) -> (i32, i32) {
    %c0_i32 = arith.constant 0 : i32
    %c0_i32_0 = arith.constant 0 : i32
    %c0_i32_1 = arith.constant 0 : i32
    return %c0_i32, %c0_i32_0 : i32, i32
  }
  func.func @transform_4(%arg0: i32) -> (i32, i32) {
    %c0_i32 = arith.constant 0 : i32
    %c0_i32_0 = arith.constant 0 : i32
    %c0_i32_1 = arith.constant 0 : i32
    return %c0_i32, %c0_i32_0 : i32, i32
  }
  func.func @transform_5(%arg0: i32) -> (i32, i32) {
    %c0_i32 = arith.constant 0 : i32
    %c0_i32_0 = arith.constant 0 : i32
    return %arg0, %c0_i32 : i32, i32
  }
}

</mosaic_0001>

<bundles_post_ra>
// kernel: tpu_custom_call.1
= control target key start
LH: loop header
LB: loop body
LE: loop exit
PB: predicated region body
PF: predicated region fallthrough
CT: control target
= control target key end

     0   :  { %s1289_s0 = inlined_call_operand.hbm [shape: bf16[16,32], index: 0, kind: input, shape index: {}]   ;;  %s1290_s1 = inlined_call_operand.hbm [shape: bf16[32,256], index: 1, kind: input, shape index: {}]   ;;  %s1291_s2 = inlined_call_operand.vmem [shape: f32[1,256], index: 2, kind: input, shape index: {}]   ;;  %s1292_s3 = inlined_call_operand.vmem [shape: f32[1,256], index: 3, kind: input, shape index: {}]   ;;  %s1293_s4 = inlined_call_operand.<no memory space> [shape: f32[1,1], index: 4, kind: input, shape index: {}]   ;;  %s1294_s5 = inlined_call_operand.vmem [shape: f32[128,1], index: 5, kind: output, shape index: {}]  }
   0x1   :  { %v10_v0 = vstv %s1293_s4 }
   0x2   :  { %11 = vst [vmem:[#allocation2] sm:$0x1] %v10_v0 }
   0x3   :  { %12 = vsyncpa [#allocation4], 0 }
   0x4   :  { %13 = vsyncpa [#allocation6], 0 }
   0x5   :  { %17 = vsyncadd [#allocation4], 896  ;;  %s18_s22 = sshll.u32 %s1289_s0, 4  ;;  %s948_s23 = smov [#allocation3]   ;;  %s19_s22 = int_to_ptr.hbm [resolvable:$true] %s18_s22 }
   0x6   :  { %s20_s24 = sshll.u32 %s948_s23, 4  ;;  %s31_s27 = sshll.u32 %s1290_s1, 4  ;;  %s21_s24 = int_to_ptr.vmem [resolvable:$true] %s20_s24  ;;  %s32_s27 = int_to_ptr.hbm [resolvable:$true] %s31_s27 }
   0x7   :  { %s949_s28 = smov 64   ;;  %s950_s29 = smov 4  }
   0x8   :  { %26 = dma.hbm_to_vmem [thread:$0]  %s19_s22, 128, %s21_s24, [#allocation4], %s949_s28, %s949_s28, %s950_s29  }
   0x9   :  { %s951_s4 = smov [#allocation5]   ;;  %s952_s6 = smov 128  }
   0xa   :  { %s33_s30 = sshll.u32 %s951_s4, 4  ;;  %s953_s7 = smov 8   ;;  %s34_s30 = int_to_ptr.vmem [resolvable:$true] %s33_s30 }
   0xb   :  { %39 = dma.hbm_to_vmem [thread:$0]  %s32_s27, 512, %s34_s30, [#allocation6], %s952_s6, %s952_s6, %s953_s7  }
   0xc   :  { %944 = dma.done.wait [#allocation4], 1024  }
   0xd   :  { %945 = vsyncadd [#allocation4], 4294966272 }
   0xe   :  { %946 = dma.done.wait [#allocation6], 512  }
   0xf   :  { %947 = vsyncadd [#allocation6], 4294966784  ;;  %v770_v1 = vld [vmem:[#allocation5 + $0x10] sm:$0xf]  ;;  %v819_v2 = vld [vmem:[#allocation5 + $0x14] sm:$0xf0] }
  0x10   :  { %v818_v3 = vld [vmem:[#allocation5 + $0x14] sm:$0xf]  ;;  %v771_v4 = vor.u32 %v819_v2, %v770_v1  ;;  %v772_v5 = vld [vmem:[#allocation5 + $0x18] sm:$0xf0]  ;;  %v762_v6 = vld [vmem:[#allocation5] sm:$0xf] }
  0x11   :  { %v817_v7 = vld [vmem:[#allocation5 + $0x4] sm:$0xf0]  ;;  %v775_v8 = vor.u32 %v818_v3, %v772_v5  ;;  %v816_v9 = vld [vmem:[#allocation5 + $0x4] sm:$0xf]  ;;  %v764_v10 = vld [vmem:[#allocation5 + $0x8] sm:$0xf0] }
  0x12   :  { %172 = vmatpush.bf16.msra.mxu0 %v771_v4  ;;  %820 = vmatpush.bf16.msra.mxu2 %v771_v4  ;;  %v763_v11 = vor.u32 %v817_v7, %v762_v6  ;;  %v767_v12 = vor.u32 %v816_v9, %v764_v10  ;;  %v808_v13 = vld [vmem:[#allocation3] sm:$0xff]  ;;  %vm141_vm0 = vcmask 261120   ;;  %v809_v15 = vld [vmem:[#allocation3 + $0x8] sm:$0xff]  ;;  %v810_v17 = vld [vmem:[#allocation3 + $0x10] sm:$0xff]  ;;  %vm705_vm2 = vcmask 7168  }
  0x13   :  { %221 = vmatpush.bf16.msra.mxu1 %v775_v8  ;;  %822 = vmatpush.bf16.msra.mxu3 %v775_v8  ;;  %v812_v14 = vld [vmem:[#allocation3 + $0x20] sm:$0xff]  ;;  %v813_v16 = vld [vmem:[#allocation3 + $0x28] sm:$0xff]  ;;  %v814_v18 = vld [vmem:[#allocation3 + $0x30] sm:$0xff] }
  0x14   :  { %v811_v19 = vld [vmem:[#allocation3 + $0x18] sm:$0xff] }
  0x15   :  { %v815_v20 = vld [vmem:[#allocation3 + $0x38] sm:$0xff] }
  0x16   :  { %173 = vmatpush.bf16.msra.mxu0 %v763_v11  ;;  %821 = vmatpush.bf16.msra.mxu2 %v763_v11  ;;  %v75_v21 = vld [vmem:[%s1291_s2] sm:$0x3] }
  0x17   :  { %222 = vmatpush.bf16.msra.mxu1 %v767_v12  ;;  %823 = vmatpush.bf16.msra.mxu3 %v767_v12  ;;  %v1012_v22 = vperm.slane %v75_v21, 0  ;;  %v1014_v23 = vperm.slane %v75_v21, 1  ;;  %v296_v24 = vld [vmem:[%s1292_s3] sm:$0x3] }
  0x18   :  { %v1020_v28 = vperm.slane %v296_v24, 0  ;;  %v1023_v30 = vperm.slane %v296_v24, 1 }
  0x19   :  { %776 = vmatmul.msk.bf16.vlgmr.msra.gmra.mxu0 %vm141_vm0, %v808_v13  ;;  %780 = vmatmul.msk.bf16.vlgmr.msra.gmra.mxu2 %vm141_vm0, %v812_v14 }
  0x1a   :  { %784 = vmatmul.msk.bf16.vlgmr.msra.gmra.mxu1 %vm141_vm0, %v808_v13  ;;  %788 = vmatmul.msk.bf16.vlgmr.msra.gmra.mxu3 %vm141_vm0, %v812_v14 }
  0x29   :  { %777 = vmatmul.msk.bf16.gmra.mxu0 %vm141_vm0, %v809_v15  ;;  %781 = vmatmul.msk.bf16.gmra.mxu2 %vm141_vm0, %v813_v16 }
  0x2a   :  { %785 = vmatmul.msk.bf16.gmra.mxu1 %vm141_vm0, %v809_v15  ;;  %789 = vmatmul.msk.bf16.gmra.mxu3 %vm141_vm0, %v813_v16 }
  0x39   :  { %778 = vmatmul.msk.bf16.gmra.mxu0 %vm141_vm0, %v810_v17  ;;  %782 = vmatmul.msk.bf16.gmra.mxu2 %vm141_vm0, %v814_v18 }
  0x3a   :  { %786 = vmatmul.msk.bf16.gmra.mxu1 %vm141_vm0, %v810_v17  ;;  %790 = vmatmul.msk.bf16.gmra.mxu3 %vm141_vm0, %v814_v18 }
  0x49   :  { %779 = vmatmul.msk.bf16.gmra.mxu0 %vm141_vm0, %v811_v19  ;;  %783 = vmatmul.msk.bf16.gmra.mxu2 %vm141_vm0, %v815_v20 }
  0x4a   :  { %787 = vmatmul.msk.bf16.gmra.mxu1 %vm141_vm0, %v811_v19  ;;  %791 = vmatmul.msk.bf16.gmra.mxu3 %vm141_vm0, %v815_v20 }
  0x96   :  { %v175_v25 = vpop.f32.mrf.mxu0 }
  0x97   :  { %v176_v26 = vadd.f32 %v175_v25, %v1012_v22  ;;  %v224_v27 = vpop.f32.mrf.mxu1 }
  0x98   :  { %v225_v29 = vadd.f32 %v224_v27, %v1014_v23 }
  0x99   :  { %v264_v31 = vmax.f32 %v176_v26, 0.0 }
  0x9a   :  { %v265_v32 = vmax.f32 %v225_v29, 0.0 }
  0x9b   :  { %v302_v33 = vmul.f32 %v1020_v28, %v264_v31 }
  0x9c   :  { %v195_v34 = vpop.f32.mrf.mxu2  ;;  %v303_v35 = vmul.f32 %v1023_v30, %v265_v32 }
  0x9d   :  { %v196_v36 = vadd.f32 %v195_v34, %v1012_v22  ;;  %v244_v37 = vpop.f32.mrf.mxu3 }
  0x9e   :  { %v245_v38 = vadd.f32 %v244_v37, %v1014_v23  ;;  %v177_v39 = vpop.f32.mrf.mxu0  ;;  %v334_v40 = vadd.f32 %v303_v35, %v302_v33 }
  0x9f   :  { %v280_v41 = vmax.f32 %v196_v36, 0.0  ;;  %v178_v42 = vadd.f32 %v177_v39, %v1012_v22  ;;  %v226_v43 = vpop.f32.mrf.mxu1 }
  0xa0   :  { %v281_v44 = vmax.f32 %v245_v38, 0.0  ;;  %v227_v45 = vadd.f32 %v226_v43, %v1014_v23  ;;  %335 = vadd.xlane.f32.xlu0 %v334_v40 }
  0xa1   :  { %v266_v46 = vmax.f32 %v178_v42, 0.0  ;;  %v318_v47 = vmul.f32 %v1020_v28, %v280_v41 }
  0xa2   :  { %v267_v48 = vmax.f32 %v227_v45, 0.0  ;;  %v319_v49 = vmul.f32 %v1023_v30, %v281_v44 }
  0xa3   :  { %v304_v50 = vmul.f32 %v1020_v28, %v266_v46 }
  0xa4   :  { %v305_v51 = vmul.f32 %v1023_v30, %v267_v48  ;;  %v197_v52 = vpop.f32.mrf.mxu2  ;;  %v358_v53 = vadd.f32 %v319_v49, %v318_v47 }
  0xa5   :  { %v198_v54 = vadd.f32 %v197_v52, %v1012_v22  ;;  %v246_v55 = vpop.f32.mrf.mxu3 }
  0xa6   :  { %v247_v56 = vadd.f32 %v246_v55, %v1014_v23  ;;  %359 = vadd.xlane.f32.xlu2 %v358_v53  ;;  %v180_v57 = vpop.f32.mrf.mxu0  ;;  %v337_v58 = vadd.f32 %v305_v51, %v304_v50 }
  0xa7   :  { %v282_v59 = vmax.f32 %v198_v54, 0.0  ;;  %v181_v60 = vadd.f32 %v180_v57, %v1012_v22  ;;  %v229_v61 = vpop.f32.mrf.mxu1  ;;  %v382_v57 = vld [vmem:[#allocation2] sm:$0x1] }
  0xa8   :  { %v283_v62 = vmax.f32 %v247_v56, 0.0  ;;  %v230_v63 = vadd.f32 %v229_v61, %v1014_v23  ;;  %338 = vadd.xlane.f32.xlu0 %v337_v58  ;;  %824 = vpush %v382_v57 }
  0xa9   :  { %v268_v0 = vmax.f32 %v181_v60, 0.0  ;;  %v320_v1 = vmul.f32 %v1020_v28, %v282_v59 }
  0xaa   :  { %v321_v2 = vmul.f32 %v1023_v30, %v283_v62  ;;  %v269_v3 = vmax.f32 %v230_v63, 0.0 }
  0xab   :  { %v306_v4 = vmul.f32 %v1020_v28, %v268_v0 }
  0xac   :  { %v200_v5 = vpop.f32.mrf.mxu2  ;;  %v307_v6 = vmul.f32 %v1023_v30, %v269_v3  ;;  %v361_v12 = vadd.f32 %v321_v2, %v320_v1 }
  0xad   :  { %v201_v7 = vadd.f32 %v200_v5, %v1012_v22  ;;  %v249_v8 = vpop.f32.mrf.mxu3 }
  0xae   :  { %v250_v9 = vadd.f32 %v249_v8, %v1014_v23  ;;  %v182_v10 = vpop.f32.mrf.mxu0  ;;  %v340_v11 = vadd.f32 %v307_v6, %v306_v4 }
  0xaf   :  { %v284_v13 = vmax.f32 %v201_v7, 0.0  ;;  %v231_v14 = vpop.f32.mrf.mxu1  ;;  %v183_v18 = vadd.f32 %v182_v10, %v1012_v22 }
  0xb0   :  { %v285_v15 = vmax.f32 %v250_v9, 0.0  ;;  %341 = vadd.xlane.f32.xlu1 %v340_v11  ;;  %362 = vadd.xlane.f32.xlu0 %v361_v12  ;;  %v232_v19 = vadd.f32 %v231_v14, %v1014_v23 }
  0xb1   :  { %v322_v16 = vmul.f32 %v1020_v28, %v284_v13  ;;  %v270_v26 = vmax.f32 %v183_v18, 0.0 }
  0xb2   :  { %v323_v17 = vmul.f32 %v1023_v30, %v285_v15  ;;  %v271_v27 = vmax.f32 %v232_v19, 0.0 }
  0xb3   :  { %v308_v38 = vmul.f32 %v1020_v28, %v270_v26 }
  0xb4   :  { %v202_v20 = vpop.f32.mrf.mxu2  ;;  %v364_v21 = vadd.f32 %v323_v17, %v322_v16  ;;  %v309_v39 = vmul.f32 %v1023_v30, %v271_v27 }
  0xb5   :  { %v203_v24 = vadd.f32 %v202_v20, %v1012_v22  ;;  %v251_v25 = vpop.f32.mrf.mxu3 }
  0xb6   :  { %v252_v29 = vadd.f32 %v251_v25, %v1014_v23  ;;  %v185_v31 = vpop.f32.mrf.mxu0  ;;  %v343_v49 = vadd.f32 %v309_v39, %v308_v38 }
  0xb7   :  { %v286_v32 = vmax.f32 %v203_v24, 0.0  ;;  %v186_v33 = vadd.f32 %v185_v31, %v1012_v22  ;;  %v234_v34 = vpop.f32.mrf.mxu1 }
  0xb8   :  { %v287_v35 = vmax.f32 %v252_v29, 0.0  ;;  %v235_v36 = vadd.f32 %v234_v34, %v1014_v23  ;;  %365 = vadd.xlane.f32.xlu1 %v364_v21 }
  0xb9   :  { %v324_v37 = vmul.f32 %v1020_v28, %v286_v32  ;;  %v272_v41 = vmax.f32 %v186_v33, 0.0 }
  0xba   :  { %v325_v40 = vmul.f32 %v1023_v30, %v287_v35  ;;  %v273_v42 = vmax.f32 %v235_v36, 0.0 }
  0xbb   :  { %v310_v50 = vmul.f32 %v1020_v28, %v272_v41 }
  0xbc   :  { %v205_v43 = vpop.f32.mrf.mxu2  ;;  %v367_v44 = vadd.f32 %v325_v40, %v324_v37  ;;  %v311_v53 = vmul.f32 %v1023_v30, %v273_v42 }
  0xbd   :  { %v206_v45 = vadd.f32 %v205_v43, %v1012_v22  ;;  %v254_v46 = vpop.f32.mrf.mxu3 }
  0xbe   :  { %v255_v47 = vadd.f32 %v254_v46, %v1014_v23  ;;  %368 = vadd.xlane.f32.xlu2 %v367_v44  ;;  %v187_v48 = vpop.f32.mrf.mxu0  ;;  %v346_v63 = vadd.f32 %v311_v53, %v310_v50 }
  0xbf   :  { %v288_v51 = vmax.f32 %v206_v45, 0.0  ;;  %v236_v52 = vpop.f32.mrf.mxu1  ;;  %v188_v55 = vadd.f32 %v187_v48, %v1012_v22 }
  0xc0   :  { %v289_v54 = vmax.f32 %v255_v47, 0.0  ;;  %v237_v56 = vadd.f32 %v236_v52, %v1014_v23  ;;  %344 = vadd.xlane.f32.xlu1 %v343_v49 }
  0xc1   :  { %v326_v58 = vmul.f32 %v1020_v28, %v288_v51  ;;  %v274_v60 = vmax.f32 %v188_v55, 0.0 }
  0xc2   :  { %v327_v59 = vmul.f32 %v1023_v30, %v289_v54  ;;  %v275_v61 = vmax.f32 %v237_v56, 0.0 }
  0xc3   :  { %v312_v8 = vmul.f32 %v1020_v28, %v274_v60 }
  0xc4   :  { %v207_v62 = vpop.f32.mrf.mxu2  ;;  %v370_v0 = vadd.f32 %v327_v59, %v326_v58  ;;  %v313_v9 = vmul.f32 %v1023_v30, %v275_v61 }
  0xc5   :  { %v208_v1 = vadd.f32 %v207_v62, %v1012_v22  ;;  %v256_v2 = vpop.f32.mrf.mxu3 }
  0xc6   :  { %v257_v3 = vadd.f32 %v256_v2, %v1014_v23  ;;  %347 = vadd.xlane.f32.xlu2 %v346_v63  ;;  %371 = vadd.xlane.f32.xlu0 %v370_v0  ;;  %v190_v4 = vpop.f32.mrf.mxu0  ;;  %v349_v19 = vadd.f32 %v313_v9, %v312_v8 }
  0xc7   :  { %v290_v5 = vmax.f32 %v208_v1, 0.0  ;;  %v191_v6 = vadd.f32 %v190_v4, %v1012_v22  ;;  %v239_v7 = vpop.f32.mrf.mxu1 }
  0xc8   :  { %v291_v10 = vmax.f32 %v257_v3, 0.0  ;;  %v240_v11 = vadd.f32 %v239_v7, %v1014_v23 }
  0xc9   :  { %v328_v12 = vmul.f32 %v1020_v28, %v290_v5  ;;  %v276_v13 = vmax.f32 %v191_v6, 0.0 }
  0xca   :  { %v329_v14 = vmul.f32 %v1023_v30, %v291_v10  ;;  %v277_v15 = vmax.f32 %v240_v11, 0.0 }
  0xcb   :  { %v314_v16 = vmul.f32 %v1020_v28, %v276_v13 }
  0xcc   :  { %v315_v17 = vmul.f32 %v1023_v30, %v277_v15  ;;  %v210_v18 = vpop.f32.mrf.mxu2  ;;  %v373_v20 = vadd.f32 %v329_v14, %v328_v12 }
  0xcd   :  { %v211_v21 = vadd.f32 %v210_v18, %v1012_v22  ;;  %v259_v24 = vpop.f32.mrf.mxu3 }
  0xce   :  { %v260_v25 = vadd.f32 %v259_v24, %v1014_v23  ;;  %350 = vadd.xlane.f32.xlu2 %v349_v19  ;;  %v192_v26 = vpop.f32.mrf.mxu0  ;;  %v352_v27 = vadd.f32 %v315_v17, %v314_v16 }
  0xcf   :  { %v292_v29 = vmax.f32 %v211_v21, 0.0  ;;  %v193_v31 = vadd.f32 %v192_v26, %v1012_v22  ;;  %v241_v32 = vpop.f32.mrf.mxu1 }
  0xd0   :  { %v293_v33 = vmax.f32 %v260_v25, 0.0  ;;  %v242_v34 = vadd.f32 %v241_v32, %v1014_v23  ;;  %353 = vadd.xlane.f32.xlu0 %v352_v27 }
  0xd1   :  { %v330_v35 = vmul.f32 %v1020_v28, %v292_v29  ;;  %v278_v36 = vmax.f32 %v193_v31, 0.0 }
  0xd2   :  { %v331_v37 = vmul.f32 %v1023_v30, %v293_v33  ;;  %v279_v38 = vmax.f32 %v242_v34, 0.0 }
  0xd3   :  { %v316_v39 = vmul.f32 %v1020_v28, %v278_v36 }
  0xd4   :  { %v317_v40 = vmul.f32 %v1023_v30, %v279_v38  ;;  %v212_v41 = vpop.f32.mrf.mxu2  ;;  %v376_v42 = vadd.f32 %v331_v37, %v330_v35 }
  0xd5   :  { %v213_v43 = vadd.f32 %v212_v41, %v1012_v22  ;;  %v261_v44 = vpop.f32.mrf.mxu3 }
  0xd6   :  { %v262_v45 = vadd.f32 %v261_v44, %v1014_v23  ;;  %377 = vadd.xlane.f32.xlu2 %v376_v42  ;;  %v355_v46 = vadd.f32 %v317_v40, %v316_v39 }
  0xd7   :  { %v294_v47 = vmax.f32 %v213_v43, 0.0 }
  0xd8   :  { %v295_v48 = vmax.f32 %v262_v45, 0.0  ;;  %356 = vadd.xlane.f32.xlu1 %v355_v46 }
  0xd9   :  { %v332_v49 = vmul.f32 %v1020_v28, %v294_v47  ;;  %s825_s2 = spop %824 }
  0xda   :  { %v333_v50 = vmul.f32 %v1023_v30, %v295_v48  ;;  %v1087_v52 = vstv %s825_s2 }
  0xdc   :  { %v379_v51 = vadd.f32 %v333_v50, %v332_v49 }
  0xde   :  { %380 = vadd.xlane.f32.xlu0 %v379_v51 }
  0xe0   :  { %374 = vadd.xlane.f32.xlu1 %v373_v20 }
 0x113   :  { %v336_v53 = vpop.xlane.xlu0 %335 }
 0x114   :  { %v385_v22 = vadd.f32 %v1087_v52, %v336_v53 }
 0x116   :  { %v792_v54 = vmul.f32 -1.442695, %v385_v22 }
 0x118   :  { %832 = vpow2.f32 %v792_v54 }
 0x119   :  { %v360_v23 = vpop.xlane.xlu2 %359 }
 0x11a   :  { %v393_v55 = vadd.f32 %v1087_v52, %v360_v23 }
 0x11b   :  { %v339_v56 = vpop.xlane.xlu0 %338 }
 0x11c   :  { %v800_v57 = vmul.f32 -1.442695, %v393_v55  ;;  %v386_v28 = vadd.f32 %v1087_v52, %v339_v56 }
 0x11e   :  { %v833_v58 = vpop.eup %832  ;;  %834 = vpow2.f32 %v800_v57  ;;  %v793_v30 = vmul.f32 -1.442695, %v386_v28 }
 0x11f   :  { %v449_v59 = vadd.f32 1.0, %v833_v58 }
 0x120   :  { %836 = vpow2.f32 %v793_v30 }
 0x121   :  { %838 = vrcp.f32 %v449_v59  ;;  %v474_v9 = vand.u32 2147483647, %v449_v59  ;;  %v476_v10 = vand.u32 2147483648, %v449_v59  ;;  %vm470_vm3 = vweird.f32 %v449_v59 }
 0x123   :  { %v342_v60 = vpop.xlane.xlu1 %341  ;;  %v363_v61 = vpop.xlane.xlu0 %362  ;;  %vm475_vm5 = vcmp.eq.f32.partialorder %v474_v9, 8.507059e+37  ;;  %v477_v20 = vor.u32 1.1754944e-38, %v476_v10 }
 0x124   :  { %v835_v62 = vpop.eup %834  ;;  %v387_v63 = vadd.f32 %v1087_v52, %v342_v60  ;;  %v394_v0 = vadd.f32 %v1087_v52, %v363_v61 }
 0x125   :  { %v457_v1 = vadd.f32 1.0, %v835_v62 }
 0x126   :  { %v837_v2 = vpop.eup %836  ;;  %v794_v3 = vmul.f32 -1.442695, %v387_v63  ;;  %v801_v4 = vmul.f32 -1.442695, %v394_v0 }
 0x127   :  { %v839_v5 = vpop.eup %838  ;;  %840 = vrcp.f32 %v457_v1  ;;  %v1094_v7 = vadd.f32 1.0, %v837_v2  ;;  %v596_v21 = vand.u32 2147483648, %v457_v1  ;;  %v594_v35 = vand.u32 2147483647, %v457_v1 }
 0x128   :  { %v466_v6 = vmul.f32 %v839_v5, %v449_v59  ;;  %842 = vpow2.f32 %v794_v3  ;;  %vm471_vm1 = vweird.f32 %v839_v5  ;;  %vm590_vm7 = vweird.f32 %v457_v1 }
 0x129   :  { %844 = vpow2.f32 %v801_v4  ;;  %vm472_vm4 = vmor %vm470_vm3, %vm471_vm1  ;;  %v597_v39 = vor.u32 1.1754944e-38, %v596_v21  ;;  %v489_v40 = vand.u32 2147483647, %v1094_v7  ;;  %v491_v41 = vand.u32 2147483648, %v1094_v7 }
 0x12a   :  { %v467_v8 = vsub.f32 1.0, %v466_v6  ;;  %846 = vrcp.f32 %v1094_v7  ;;  %vm595_vm10 = vcmp.eq.f32.partialorder %v594_v35, 8.507059e+37  ;;  %vm485_vm11 = vweird.f32 %v1094_v7 }
 0x12b   :  { %v366_v11 = vpop.xlane.xlu1 %365  ;;  %v492_v53 = vor.u32 1.1754944e-38, %v491_v41  ;;  %vm490_vm13 = vcmp.eq.f32.partialorder %v489_v40, 8.507059e+37 }
 0x12c   :  { %v468_v12 = vmul.f32 %v839_v5, %v467_v8  ;;  %v395_v13 = vadd.f32 %v1087_v52, %v366_v11 }
 0x12d   :  { %v841_v14 = vpop.eup %840 }
 0x12e   :  { %v843_v15 = vpop.eup %842  ;;  %v469_v16 = vadd.f32 %v839_v5, %v468_v12  ;;  %v586_v17 = vmul.f32 %v841_v14, %v457_v1  ;;  %v802_v18 = vmul.f32 -1.442695, %v395_v13  ;;  %vm591_vm6 = vweird.f32 %v841_v14 }
 0x12f   :  { %v845_v19 = vpop.eup %844  ;;  %v1098_v24 = vadd.f32 1.0, %v843_v15  ;;  %vm592_vm8 = vmor %vm590_vm7, %vm591_vm6 }
 0x130   :  { %v847_v25 = vpop.eup %846  ;;  %v473_v26 = vsel %vm472_vm4, %v839_v5, %v469_v16  ;;  %v587_v27 = vsub.f32 1.0, %v586_v17  ;;  %v1100_v29 = vadd.f32 1.0, %v845_v19  ;;  %848 = vpow2.f32 %v802_v18 }
 0x131   :  { %v478_v31 = vsel %vm475_vm5, %v477_v20, %v473_v26  ;;  %v481_v32 = vmul.f32 %v847_v25, %v1094_v7  ;;  %850 = vrcp.f32 %v1098_v24  ;;  %v369_v33 = vpop.xlane.xlu2 %368  ;;  %vm486_vm9 = vweird.f32 %v847_v25 }
 0x132   :  { %706 = vst.msk [vmem:[%s1294_s5] sm:$0xff] %vm705_vm2, %v478_v31  ;;  %v588_v34 = vmul.f32 %v841_v14, %v587_v27  ;;  %852 = vrcp.f32 %v1100_v29  ;;  %v396_v43 = vadd.f32 %v1087_v52, %v369_v33  ;;  %vm487_vm12 = vmor %vm485_vm11, %vm486_vm9  ;;  %v504_v30 = vand.u32 2147483647, %v1098_v24 }
 0x133   :  { %v482_v36 = vsub.f32 1.0, %v481_v32  ;;  %v345_v37 = vpop.xlane.xlu1 %344  ;;  %v506_v60 = vand.u32 2147483648, %v1098_v24  ;;  %vm500_vm15 = vweird.f32 %v1098_v24  ;;  %v609_v1 = vand.u32 2147483647, %v1100_v29 }
 0x134   :  { %v589_v38 = vadd.f32 %v841_v14, %v588_v34  ;;  %v388_v44 = vadd.f32 %v1087_v52, %v345_v37  ;;  %v803_v51 = vmul.f32 -1.442695, %v396_v43  ;;  %v611_v2 = vand.u32 2147483648, %v1100_v29 }
 0x135   :  { %v483_v42 = vmul.f32 %v847_v25, %v482_v36  ;;  %v507_v8 = vor.u32 1.1754944e-38, %v506_v60  ;;  %vm605_vm3 = vweird.f32 %v1100_v29  ;;  %vm505_vm4 = vcmp.eq.f32.partialorder %v504_v30, 8.507059e+37 }
 0x136   :  { %v849_v45 = vpop.eup %848  ;;  %v593_v46 = vsel %vm592_vm8, %v841_v14, %v589_v38  ;;  %v795_v54 = vmul.f32 -1.442695, %v388_v44  ;;  %v612_v14 = vor.u32 1.1754944e-38, %v611_v2  ;;  %vm610_vm6 = vcmp.eq.f32.partialorder %v609_v1, 8.507059e+37 }
 0x137   :  { %v851_v47 = vpop.eup %850  ;;  %v598_v48 = vsel %vm595_vm10, %v597_v39, %v593_v46  ;;  %v484_v49 = vadd.f32 %v847_v25, %v483_v42  ;;  %v1114_v50 = vadd.f32 1.0, %v849_v45 }
 0x138   :  { %714 = vst.msk [vmem:[%s1294_s5 + $0x40] sm:$0xff] %vm705_vm2, %v598_v48  ;;  %v496_v22 = vmul.f32 %v851_v47, %v1098_v24  ;;  %v853_v23 = vpop.eup %852  ;;  %vm501_vm14 = vweird.f32 %v851_v47 }
 0x139   :  { %v488_v55 = vsel %vm487_vm12, %v847_v25, %v484_v49  ;;  %854 = vrcp.f32 %v1114_v50  ;;  %v348_v56 = vpop.xlane.xlu2 %347  ;;  %v372_v57 = vpop.xlane.xlu0 %371  ;;  %v601_v59 = vmul.f32 %v853_v23, %v1100_v29  ;;  %vm606_vm0 = vweird.f32 %v853_v23  ;;  %vm502_vm1 = vmor %vm500_vm15, %vm501_vm14 }
 0x13a   :  { %v493_v28 = vsel %vm490_vm13, %v492_v53, %v488_v55  ;;  %v497_v58 = vsub.f32 1.0, %v496_v22  ;;  %856 = vpow2.f32 %v803_v51  ;;  %v389_v61 = vadd.f32 %v1087_v52, %v348_v56  ;;  %vm607_vm5 = vmor %vm605_vm3, %vm606_vm0 }
 0x13b   :  { %707 = vst.msk [vmem:[%s1294_s5 + $0x8] sm:$0xff] %vm705_vm2, %v493_v28  ;;  %v602_v63 = vsub.f32 1.0, %v601_v59  ;;  %858 = vpow2.f32 %v795_v54  ;;  %v397_v0 = vadd.f32 %v1087_v52, %v372_v57  ;;  %v626_v21 = vand.u32 2147483648, %v1114_v50 }
 0x13c   :  { %v498_v62 = vmul.f32 %v851_v47, %v497_v58  ;;  %v796_v3 = vmul.f32 -1.442695, %v389_v61  ;;  %v624_v27 = vand.u32 2147483647, %v1114_v50  ;;  %vm620_vm8 = vweird.f32 %v1114_v50 }
 0x13d   :  { %v603_v5 = vmul.f32 %v853_v23, %v602_v63  ;;  %v804_v6 = vmul.f32 -1.442695, %v397_v0  ;;  %v627_v35 = vor.u32 1.1754944e-38, %v626_v21 }
 0x13e   :  { %v499_v4 = vadd.f32 %v851_v47, %v498_v62  ;;  %860 = vpow2.f32 %v796_v3  ;;  %vm625_vm10 = vcmp.eq.f32.partialorder %v624_v27, 8.507059e+37 }
 0x13f   :  { %v855_v7 = vpop.eup %854  ;;  %v604_v10 = vadd.f32 %v853_v23, %v603_v5  ;;  %862 = vpow2.f32 %v804_v6 }
 0x140   :  { %v503_v9 = vsel %vm502_vm1, %v851_v47, %v499_v4  ;;  %v616_v11 = vmul.f32 %v855_v7, %v1114_v50  ;;  %v857_v12 = vpop.eup %856  ;;  %vm621_vm7 = vweird.f32 %v855_v7 }
 0x141   :  { %v508_v13 = vsel %vm505_vm4, %v507_v8, %v503_v9  ;;  %v351_v15 = vpop.xlane.xlu2 %350  ;;  %v859_v16 = vpop.eup %858  ;;  %v608_v17 = vsel %vm607_vm5, %v853_v23, %v604_v10  ;;  %v1141_v19 = vadd.f32 1.0, %v857_v12  ;;  %vm622_vm9 = vmor %vm620_vm8, %vm621_vm7 }
 0x142   :  { %708 = vst.msk [vmem:[%s1294_s5 + $0x10] sm:$0xff] %vm705_vm2, %v508_v13  ;;  %v617_v18 = vsub.f32 1.0, %v616_v11  ;;  %v613_v20 = vsel %vm610_vm6, %v612_v14, %v608_v17  ;;  %v1144_v24 = vadd.f32 1.0, %v859_v16  ;;  %v390_v25 = vadd.f32 %v1087_v52, %v351_v15 }
 0x143   :  { %715 = vst.msk [vmem:[%s1294_s5 + $0x48] sm:$0xff] %vm705_vm2, %v613_v20  ;;  %864 = vrcp.f32 %v1141_v19  ;;  %v354_v29 = vpop.xlane.xlu0 %353  ;;  %v639_v39 = vand.u32 2147483647, %v1141_v19  ;;  %v641_v41 = vand.u32 2147483648, %v1141_v19  ;;  %vm635_vm11 = vweird.f32 %v1141_v19 }
 0x144   :  { %v618_v26 = vmul.f32 %v855_v7, %v617_v18  ;;  %v861_v31 = vpop.eup %860  ;;  %866 = vrcp.f32 %v1144_v24  ;;  %v797_v36 = vmul.f32 -1.442695, %v390_v25  ;;  %v391_v37 = vadd.f32 %v1087_v52, %v354_v29 }
 0x145   :  { %v1155_v33 = vadd.f32 1.0, %v861_v31  ;;  %v863_v34 = vpop.eup %862  ;;  %v519_v45 = vand.u32 2147483647, %v1144_v24  ;;  %vm1171_vm12 = vcmp.eq.f32.partialorder %v639_v39, 8.507059e+37  ;;  %vm515_vm13 = vweird.f32 %v1144_v24 }
 0x146   :  { %v619_v32 = vadd.f32 %v855_v7, %v618_v26  ;;  %v1161_v42 = vadd.f32 1.0, %v863_v34  ;;  %v798_v46 = vmul.f32 -1.442695, %v391_v37  ;;  %v642_v54 = vor.u32 1.1754944e-38, %v641_v41 }
 0x147   :  { %868 = vrcp.f32 %v1155_v33  ;;  %v521_v23 = vand.u32 2147483648, %v1144_v24  ;;  %vm1179_vm14 = vcmp.eq.f32.partialorder %v519_v45, 8.507059e+37  ;;  %v534_v60 = vand.u32 2147483647, %v1155_v33 }
 0x148   :  { %v623_v38 = vsel %vm622_vm9, %v855_v7, %v619_v32  ;;  %870 = vpow2.f32 %v797_v36  ;;  %v536_v2 = vand.u32 2147483648, %v1155_v33  ;;  %vm530_vm3 = vweird.f32 %v1155_v33 }
 0x149   :  { %v628_v40 = vsel %vm625_vm10, %v627_v35, %v623_v38  ;;  %v378_v43 = vpop.xlane.xlu2 %377  ;;  %v865_v44 = vpop.eup %864  ;;  %872 = vrcp.f32 %v1161_v42  ;;  %v522_v6 = vor.u32 1.1754944e-38, %v521_v23  ;;  %vm1198_vm6 = vcmp.eq.f32.partialorder %v534_v60, 8.507059e+37 }
 0x14a   :  { %716 = vst.msk [vmem:[%s1294_s5 + $0x50] sm:$0xff] %vm705_vm2, %v628_v40  ;;  %v399_v47 = vadd.f32 %v1087_v52, %v378_v43  ;;  %v867_v48 = vpop.eup %866  ;;  %v631_v49 = vmul.f32 %v865_v44, %v1141_v19  ;;  %874 = vpow2.f32 %v798_v46  ;;  %vm636_vm15 = vweird.f32 %v865_v44 }
 0x14b   :  { %v357_v50 = vpop.xlane.xlu1 %356  ;;  %v511_v53 = vmul.f32 %v867_v48, %v1144_v24  ;;  %vm516_vm0 = vweird.f32 %v867_v48  ;;  %vm637_vm1 = vmor %vm635_vm11, %vm636_vm15  ;;  %v537_v17 = vor.u32 1.1754944e-38, %v536_v2  ;;  %v654_v20 = vand.u32 2147483647, %v1161_v42 }
 0x14c   :  { %v632_v22 = vsub.f32 1.0, %v631_v49  ;;  %v806_v28 = vmul.f32 -1.442695, %v399_v47  ;;  %v392_v58 = vadd.f32 %v1087_v52, %v357_v50  ;;  %vm517_vm4 = vmor %vm515_vm13, %vm516_vm0  ;;  %v656_v21 = vand.u32 2147483648, %v1161_v42 }
 0x14d   :  { %v869_v55 = vpop.eup %868  ;;  %v512_v56 = vsub.f32 1.0, %v511_v53  ;;  %vm650_vm9 = vweird.f32 %v1161_v42  ;;  %vm655_vm11 = vcmp.eq.f32.partialorder %v654_v20, 8.507059e+37 }
 0x14e   :  { %v633_v30 = vmul.f32 %v865_v44, %v632_v22  ;;  %v526_v59 = vmul.f32 %v869_v55, %v1155_v33  ;;  %v871_v61 = vpop.eup %870  ;;  %876 = vpow2.f32 %v806_v28  ;;  %v799_v63 = vmul.f32 -1.442695, %v392_v58 }
 0x14f   :  { %v513_v62 = vmul.f32 %v867_v48, %v512_v56  ;;  %v1187_v3 = vadd.f32 1.0, %v871_v61  ;;  %v873_v4 = vpop.eup %872  ;;  %vm531_vm5 = vweird.f32 %v869_v55  ;;  %v657_v36 = vor.u32 1.1754944e-38, %v656_v21 }
 0x150   :  { %v634_v0 = vadd.f32 %v865_v44, %v633_v30  ;;  %v527_v1 = vsub.f32 1.0, %v526_v59  ;;  %878 = vpow2.f32 %v799_v63  ;;  %v875_v7 = vpop.eup %874  ;;  %v646_v10 = vmul.f32 %v873_v4, %v1161_v42  ;;  %vm532_vm7 = vmor %vm530_vm3, %vm531_vm5 }
 0x151   :  { %v514_v5 = vadd.f32 %v867_v48, %v513_v62  ;;  %v381_v11 = vpop.xlane.xlu0 %380  ;;  %880 = vrcp.f32 %v1187_v3  ;;  %v1217_v24 = vadd.f32 1.0, %v875_v7  ;;  %vm651_vm8 = vweird.f32 %v873_v4 }
 0x152   :  { %v638_v8 = vsel %vm637_vm1, %v865_v44, %v634_v0  ;;  %v528_v9 = vmul.f32 %v869_v55, %v527_v1  ;;  %v647_v18 = vsub.f32 1.0, %v646_v10  ;;  %v400_v25 = vadd.f32 %v1087_v52, %v381_v11  ;;  %vm652_vm10 = vmor %vm650_vm9, %vm651_vm8 }
 0x153   :  { %v643_v12 = vsel %vm1171_vm12, %v642_v54, %v638_v8  ;;  %v518_v13 = vsel %vm517_vm4, %v867_v48, %v514_v5  ;;  %v375_v31 = vpop.xlane.xlu1 %374  ;;  %882 = vrcp.f32 %v1217_v24  ;;  %v549_v44 = vand.u32 2147483647, %v1187_v3 }
 0x154   :  { %717 = vst.msk [vmem:[%s1294_s5 + $0x58] sm:$0xff] %vm705_vm2, %v643_v12  ;;  %v523_v15 = vsel %vm1179_vm14, %v522_v6, %v518_v13  ;;  %v529_v16 = vadd.f32 %v869_v55, %v528_v9  ;;  %v877_v19 = vpop.eup %876  ;;  %v648_v27 = vmul.f32 %v873_v4, %v647_v18  ;;  %v807_v38 = vmul.f32 -1.442695, %v400_v25 }
 0x155   :  { %709 = vst.msk [vmem:[%s1294_s5 + $0x18] sm:$0xff] %vm705_vm2, %v523_v15  ;;  %v1220_v29 = vadd.f32 1.0, %v877_v19  ;;  %v398_v39 = vadd.f32 %v1087_v52, %v375_v31  ;;  %v551_v45 = vand.u32 2147483648, %v1187_v3  ;;  %vm545_vm12 = vweird.f32 %v1187_v3 }
 0x156   :  { %v533_v26 = vsel %vm532_vm7, %v869_v55, %v529_v16  ;;  %v879_v32 = vpop.eup %878  ;;  %v649_v33 = vadd.f32 %v873_v4, %v648_v27  ;;  %vm1244_vm14 = vcmp.eq.f32.partialorder %v549_v44, 8.507059e+37  ;;  %v564_v23 = vand.u32 2147483647, %v1217_v24 }
 0x157   :  { %v538_v34 = vsel %vm1198_vm6, %v537_v17, %v533_v26  ;;  %884 = vrcp.f32 %v1220_v29  ;;  %v881_v35 = vpop.eup %880  ;;  %v1231_v37 = vadd.f32 1.0, %v879_v32  ;;  %v805_v52 = vmul.f32 -1.442695, %v398_v39 }
 0x158   :  { %710 = vst.msk [vmem:[%s1294_s5 + $0x20] sm:$0xff] %vm705_vm2, %v538_v34  ;;  %v653_v40 = vsel %vm652_vm10, %v873_v4, %v649_v33  ;;  %v541_v41 = vmul.f32 %v881_v35, %v1187_v3  ;;  %vm546_vm13 = vweird.f32 %v881_v35  ;;  %v552_v51 = vor.u32 1.1754944e-38, %v551_v45 }
 0x159   :  { %v658_v43 = vsel %vm655_vm11, %v657_v36, %v653_v40  ;;  %886 = vrcp.f32 %v1231_v37  ;;  %v883_v46 = vpop.eup %882  ;;  %v566_v55 = vand.u32 2147483648, %v1217_v24  ;;  %vm547_vm15 = vmor %vm545_vm12, %vm546_vm13  ;;  %vm560_vm0 = vweird.f32 %v1217_v24 }
 0x15a   :  { %718 = vst.msk [vmem:[%s1294_s5 + $0x60] sm:$0xff] %vm705_vm2, %v658_v43  ;;  %v542_v42 = vsub.f32 1.0, %v541_v41  ;;  %888 = vpow2.f32 %v807_v38  ;;  %v556_v49 = vmul.f32 %v883_v46, %v1217_v24  ;;  %v684_v57 = vand.u32 2147483647, %v1220_v29 }
 0x15b   :  { %890 = vpow2.f32 %v805_v52  ;;  %v686_v28 = vand.u32 2147483648, %v1220_v29  ;;  %vm561_vm1 = vweird.f32 %v883_v46  ;;  %vm680_vm3 = vweird.f32 %v1220_v29 }
 0x15c   :  { %v543_v48 = vmul.f32 %v881_v35, %v542_v42  ;;  %v557_v54 = vsub.f32 1.0, %v556_v49  ;;  %vm565_vm5 = vcmp.eq.f32.partialorder %v564_v23, 8.507059e+37  ;;  %v567_v1 = vor.u32 1.1754944e-38, %v566_v55  ;;  %vm562_vm6 = vmor %vm560_vm0, %vm561_vm1 }
 0x15d   :  { %v885_v47 = vpop.eup %884  ;;  %vm685_vm7 = vcmp.eq.f32.partialorder %v684_v57, 8.507059e+37  ;;  %v687_v5 = vor.u32 1.1754944e-38, %v686_v28  ;;  %v579_v8 = vand.u32 2147483647, %v1231_v37  ;;  %v581_v9 = vand.u32 2147483648, %v1231_v37 }
 0x15e   :  { %v676_v53 = vmul.f32 %v885_v47, %v1220_v29  ;;  %v544_v22 = vadd.f32 %v881_v35, %v543_v48  ;;  %v558_v59 = vmul.f32 %v883_v46, %v557_v54  ;;  %vm681_vm4 = vweird.f32 %v885_v47 }
 0x15f   :  { %v887_v58 = vpop.eup %886  ;;  %vm682_vm8 = vmor %vm680_vm3, %vm681_vm4  ;;  %vm575_vm10 = vweird.f32 %v1231_v37  ;;  %v582_v16 = vor.u32 1.1754944e-38, %v581_v9  ;;  %vm580_vm12 = vcmp.eq.f32.partialorder %v579_v8, 8.507059e+37 }
 0x160   :  { %v677_v56 = vsub.f32 1.0, %v676_v53  ;;  %v548_v30 = vsel %vm547_vm15, %v881_v35, %v544_v22  ;;  %v889_v60 = vpop.eup %888  ;;  %v571_v63 = vmul.f32 %v887_v58, %v1231_v37  ;;  %v559_v0 = vadd.f32 %v883_v46, %v558_v59 }
 0x161   :  { %v553_v61 = vsel %vm1244_vm14, %v552_v51, %v548_v30  ;;  %v464_v2 = vadd.f32 1.0, %v889_v60  ;;  %v891_v3 = vpop.eup %890  ;;  %vm576_vm9 = vweird.f32 %v887_v58 }
 0x162   :  { %v678_v62 = vmul.f32 %v885_v47, %v677_v56  ;;  %711 = vst.msk [vmem:[%s1294_s5 + $0x28] sm:$0xff] %vm705_vm2, %v553_v61  ;;  %v572_v6 = vsub.f32 1.0, %v571_v63  ;;  %v563_v7 = vsel %vm562_vm6, %v883_v46, %v559_v0  ;;  %v462_v14 = vadd.f32 1.0, %v891_v3  ;;  %vm577_vm11 = vmor %vm575_vm10, %vm576_vm9 }
 0x163   :  { %892 = vrcp.f32 %v464_v2  ;;  %v568_v10 = vsel %vm565_vm5, %v567_v1, %v563_v7  ;;  %v699_v25 = vand.u32 2147483647, %v464_v2  ;;  %v701_v26 = vand.u32 2147483648, %v464_v2 }
 0x164   :  { %v679_v4 = vadd.f32 %v885_v47, %v678_v62  ;;  %v573_v12 = vmul.f32 %v887_v58, %v572_v6  ;;  %712 = vst.msk [vmem:[%s1294_s5 + $0x30] sm:$0xff] %vm705_vm2, %v568_v10  ;;  %894 = vrcp.f32 %v462_v14  ;;  %vm695_vm14 = vweird.f32 %v464_v2 }
 0x165   :  { %vm700_vm0 = vcmp.eq.f32.partialorder %v699_v25, 8.507059e+37  ;;  %v702_v34 = vor.u32 1.1754944e-38, %v701_v26  ;;  %v671_v33 = vand.u32 2147483648, %v462_v14  ;;  %v669_v37 = vand.u32 2147483647, %v462_v14 }
 0x166   :  { %v683_v11 = vsel %vm682_vm8, %v885_v47, %v679_v4  ;;  %v574_v15 = vadd.f32 %v887_v58, %v573_v12  ;;  %vm665_vm3 = vweird.f32 %v462_v14 }
 0x167   :  { %v688_v13 = vsel %vm685_vm7, %v687_v5, %v683_v11  ;;  %v672_v40 = vor.u32 1.1754944e-38, %v671_v33  ;;  %vm670_vm5 = vcmp.eq.f32.partialorder %v669_v37, 8.507059e+37 }
 0x168   :  { %720 = vst.msk [vmem:[%s1294_s5 + $0x70] sm:$0xff] %vm705_vm2, %v688_v13  ;;  %v578_v17 = vsel %vm577_vm11, %v887_v58, %v574_v15 }
 0x169   :  { %v893_v18 = vpop.eup %892  ;;  %v583_v19 = vsel %vm580_vm12, %v582_v16, %v578_v17 }
 0x16a   :  { %713 = vst.msk [vmem:[%s1294_s5 + $0x38] sm:$0xff] %vm705_vm2, %v583_v19  ;;  %v691_v20 = vmul.f32 %v893_v18, %v464_v2  ;;  %v895_v24 = vpop.eup %894  ;;  %vm696_vm13 = vweird.f32 %v893_v18 }
 0x16b   :  { %v661_v29 = vmul.f32 %v895_v24, %v462_v14  ;;  %vm697_vm15 = vmor %vm695_vm14, %vm696_vm13  ;;  %vm666_vm1 = vweird.f32 %v895_v24 }
 0x16c   :  { %v692_v21 = vsub.f32 1.0, %v691_v20  ;;  %vm667_vm4 = vmor %vm665_vm3, %vm666_vm1 }
 0x16d   :  { %v662_v32 = vsub.f32 1.0, %v661_v29 }
 0x16e   :  { %v693_v27 = vmul.f32 %v893_v18, %v692_v21 }
 0x16f   :  { %v663_v36 = vmul.f32 %v895_v24, %v662_v32 }
 0x170   :  { %v694_v31 = vadd.f32 %v893_v18, %v693_v27 }
 0x171   :  { %v664_v39 = vadd.f32 %v895_v24, %v663_v36 }
 0x172   :  { %v698_v35 = vsel %vm697_vm15, %v893_v18, %v694_v31 }
 0x173   :  { %v703_v38 = vsel %vm700_vm0, %v702_v34, %v698_v35  ;;  %v668_v41 = vsel %vm667_vm4, %v895_v24, %v664_v39 }
 0x174   :  { %721 = vst.msk [vmem:[%s1294_s5 + $0x78] sm:$0xff] %vm705_vm2, %v703_v38  ;;  %v673_v43 = vsel %vm670_vm5, %v672_v40, %v668_v41 }
 0x175   :  { %719 = vst.msk [vmem:[%s1294_s5 + $0x68] sm:$0xff] %vm705_vm2, %v673_v43 }
 0x176   :  { %726 = vsyncpa [#allocation4], 1 }
 0x177   :  { %727 = vsyncpa [#allocation6], 1 }

</bundles_post_ra>
